<compile_context>
chip_gen: v5e
topology: v5e:2x2
jax: 0.10.0
libtpu: 0.0.40
codegen_flags: <defaults>
</compile_context>

<pallas_src>
import functools

import jax
import jax.numpy as jnp
from jax import lax
from jax.experimental import pallas as pl
from jax.experimental.pallas import tpu as pltpu


def _conv3x3_s2_kernel(p00_ref, p01_ref, p10_ref, p11_ref, w_ref, b_ref,
                       o_ref, *, ho, wo, cin, cout_tile):
    """One (cout-tile, batch-element) grid step.

    p??_ref : (1, ho+1, wo+1, Cin)  polyphase components of the padded input,
                                    phase[r][c][i, j] == x_pad[2*i + r, 2*j + c]
    w_ref   : (9*Cin, TC)           weights, rows ordered (kh, kw, cin)
    b_ref   : (1, TC)               bias tile
    o_ref   : (1, ho, wo, TC)       output tile
    """
    m = ho * wo

    def tap(ref, dr, dc):
        # Unit-stride static slice of one polyphase component -> (Ho*Wo, Cin).
        return ref[0, dr:dr + ho, dc:dc + wo, :].reshape(m, cin)

    # im2col tile; column blocks ordered (kh, kw) to match w_ref's rows.
    # Tap (kh, kw) at output (i, j) reads x_pad[2i + kh, 2j + kw]
    #   = phase[kh % 2][kw % 2][i + kh // 2, j + kw // 2].
    cols = jnp.concatenate(
        [
            tap(p00_ref, 0, 0),  # (kh, kw) = (0, 0)
            tap(p01_ref, 0, 0),  # (0, 1)
            tap(p00_ref, 0, 1),  # (0, 2)
            tap(p10_ref, 0, 0),  # (1, 0)
            tap(p11_ref, 0, 0),  # (1, 1)
            tap(p10_ref, 0, 1),  # (1, 2)
            tap(p00_ref, 1, 0),  # (2, 0)
            tap(p01_ref, 1, 0),  # (2, 1)
            tap(p00_ref, 1, 1),  # (2, 2)
        ],
        axis=1,
    )  # (Ho*Wo, 9*Cin)

    # Single MXU matmul, K = 9*Cin, f32 accumulation; bias add in f32.
    acc = jnp.dot(cols, w_ref[...], preferred_element_type=jnp.float32)
    acc = acc + b_ref[...].astype(jnp.float32)
    o_ref[0] = acc.reshape(ho, wo, cout_tile).astype(o_ref.dtype)


def _pick_cout_tile(c):
    # Lane-dense, MXU-aligned output-channel tiles when the channel count allows.
    for tc in (256, 128):
        if c % tc == 0:
            return tc
    return c  # small-channel fallback (e.g. the demo's C=4)


def downsample_forward(x_nchw, w_oihw, bias):
    """Equivalent of Downsample(dim).forward(x) with x in NCHW (nn.Conv2d)."""
    n, c, h, w = x_nchw.shape
    ho = (h - 1) // 2 + 1
    wo = (w - 1) // 2 + 1

    # ---- glue: layout + padding (done once, in HBM) -------------------------
    # Pad so both padded extents are even (>= the standard padding=1), which
    # makes the polyphase split clean and handles odd H/W correctly.
    hp = 2 * (ho + 1)
    wp = 2 * (wo + 1)
    x_nhwc = jnp.transpose(x_nchw, (0, 2, 3, 1))
    x_pad = jnp.pad(x_nhwc, ((0, 0), (1, hp - 1 - h), (1, wp - 1 - w), (0, 0)))

    # Polyphase (space-to-depth) split: the kernel only ever does unit-stride
    # slices of these.  Each phase: (N, ho+1, wo+1, C).
    p00 = x_pad[:, 0::2, 0::2, :]
    p01 = x_pad[:, 0::2, 1::2, :]
    p10 = x_pad[:, 1::2, 0::2, :]
    p11 = x_pad[:, 1::2, 1::2, :]

    # OIHW -> HWIO -> one (9*Cin, Cout) matrix (row order: kh, kw, cin).
    w_mat = jnp.transpose(w_oihw, (2, 3, 1, 0)).reshape(9 * c, c)
    b2d = bias.reshape(1, c)

    tc = _pick_cout_tile(c)
    n_co = c // tc

    kernel = functools.partial(
        _conv3x3_s2_kernel, ho=ho, wo=wo, cin=c, cout_tile=tc
    )

    phase_spec = pl.BlockSpec((1, ho + 1, wo + 1, c), lambda co, i: (i, 0, 0, 0))

    out_nhwc = pl.pallas_call(
        kernel,
        out_shape=jax.ShapeDtypeStruct((n, ho, wo, c), x_nchw.dtype),
        grid_spec=pltpu.PrefetchScalarGridSpec(
            num_scalar_prefetch=0,
            # Cout tiles outer, batch inner: weight/bias block index is constant
            # along the inner axis -> they stay resident, no re-streaming.
            grid=(n_co, n),
            in_specs=[
                phase_spec, phase_spec, phase_spec, phase_spec,
                pl.BlockSpec((9 * c, tc), lambda co, i: (0, co)),
                pl.BlockSpec((1, tc), lambda co, i: (0, co)),
            ],
            out_specs=pl.BlockSpec((1, ho, wo, tc), lambda co, i: (i, 0, 0, co)),
        ),
        compiler_params=pltpu.CompilerParams(
            dimension_semantics=("parallel", "parallel"),
            vmem_limit_bytes=64 * 1024 * 1024,
        ),
    )(p00, p01, p10, p11, w_mat, b2d)

    # NHWC -> NCHW to match the PyTorch module's output layout.
    return jnp.transpose(out_nhwc, (0, 3, 1, 2))


if __name__ == "__main__":
    key = jax.random.PRNGKey(0)
    kx, kw_, kb = jax.random.split(key, 3)

    N, DIM = 2, 4

    # Deterministic parameter init (mimicking PyTorch Conv2d default ranges).
    fan_in = DIM * 3 * 3
    bound = 1.0 / (fan_in ** 0.5)
    w_oihw = jax.random.uniform(
        kw_, (DIM, DIM, 3, 3), minval=-bound, maxval=bound, dtype=jnp.float32
    )
    bias = jax.random.uniform(
        kb, (DIM,), minval=-bound, maxval=bound, dtype=jnp.float32
    )

    def reference(x):
        return lax.conv_general_dilated(
            x, w_oihw, window_strides=(2, 2), padding=((1, 1), (1, 1)),
            dimension_numbers=("NCHW", "OIHW", "NCHW"),
        ) + bias.reshape(1, DIM, 1, 1)

    # Even-sized demo shape, plus an odd-sized case (which the previous version
    # could not handle) to confirm Conv2d stride-2 semantics match exactly.
    for (H, W) in ((16, 16), (15, 15)):
        x = jax.random.normal(kx, (N, DIM, H, W), dtype=jnp.float32)
        out = jax.block_until_ready(downsample_forward(x, w_oihw, bias))
        ref = reference(x)
        assert out.shape == ref.shape, (out.shape, ref.shape)
        assert jnp.allclose(out, ref, atol=1e-5, rtol=1e-5), f"mismatch at {(H, W)}"

    print("KERNEL_OK")
</pallas_src>

<mosaic_0001>
module attributes {stable_mosaic.version = 11 : i64} {
  func.func @_conv3x3_s2_kernel(%arg0: i32, %arg1: i32, %arg2: memref<1x9x9x4xf32, #tpu.memory_space<vmem>>, %arg3: memref<1x9x9x4xf32, #tpu.memory_space<vmem>>, %arg4: memref<1x9x9x4xf32, #tpu.memory_space<vmem>>, %arg5: memref<1x9x9x4xf32, #tpu.memory_space<vmem>>, %arg6: memref<36x4xf32, #tpu.memory_space<vmem>>, %arg7: memref<1x4xf32, #tpu.memory_space<vmem>>, %arg8: memref<1x8x8x4xf32, #tpu.memory_space<vmem>>) attributes {dimension_semantics = [#tpu.dimension_semantics<parallel>, #tpu.dimension_semantics<parallel>], iteration_bounds = array<i64: 1, 2>, scalar_prefetch = 0 : i64, scratch_operands = 0 : i64, tpu.core_type = #tpu.core_type<tc>, window_params = [{transform_indices = @transform_0, window_bounds = array<i64: 1, 9, 9, 4>}, {transform_indices = @transform_1, window_bounds = array<i64: 1, 9, 9, 4>}, {transform_indices = @transform_2, window_bounds = array<i64: 1, 9, 9, 4>}, {transform_indices = @transform_3, window_bounds = array<i64: 1, 9, 9, 4>}, {transform_indices = @transform_4, window_bounds = array<i64: 36, 4>}, {transform_indices = @transform_5, window_bounds = array<i64: 1, 4>}, {transform_indices = @transform_6, window_bounds = array<i64: 1, 8, 8, 4>}]} {
    %c0 = arith.constant 0 : index
    %c0_0 = arith.constant 0 : index
    %c0_1 = arith.constant 0 : index
    %c0_2 = arith.constant 0 : index
    %0 = vector.load %arg2[%c0, %c0_0, %c0_1, %c0_2] : memref<1x9x9x4xf32, #tpu.memory_space<vmem>>, vector<1x8x8x4xf32>
    %1 = vector.shape_cast %0 : vector<1x8x8x4xf32> to vector<8x8x4xf32>
    %2 = vector.shape_cast %1 : vector<8x8x4xf32> to vector<64x4xf32>
    %c0_3 = arith.constant 0 : index
    %c0_4 = arith.constant 0 : index
    %c0_5 = arith.constant 0 : index
    %c0_6 = arith.constant 0 : index
    %3 = vector.load %arg3[%c0_3, %c0_4, %c0_5, %c0_6] : memref<1x9x9x4xf32, #tpu.memory_space<vmem>>, vector<1x8x8x4xf32>
    %4 = vector.shape_cast %3 : vector<1x8x8x4xf32> to vector<8x8x4xf32>
    %5 = vector.shape_cast %4 : vector<8x8x4xf32> to vector<64x4xf32>
    %c0_7 = arith.constant 0 : index
    %c0_8 = arith.constant 0 : index
    %c1 = arith.constant 1 : index
    %c0_9 = arith.constant 0 : index
    %6 = vector.load %arg2[%c0_7, %c0_8, %c1, %c0_9] : memref<1x9x9x4xf32, #tpu.memory_space<vmem>>, vector<1x8x8x4xf32>
    %7 = vector.shape_cast %6 : vector<1x8x8x4xf32> to vector<8x8x4xf32>
    %8 = vector.shape_cast %7 : vector<8x8x4xf32> to vector<64x4xf32>
    %c0_10 = arith.constant 0 : index
    %c0_11 = arith.constant 0 : index
    %c0_12 = arith.constant 0 : index
    %c0_13 = arith.constant 0 : index
    %9 = vector.load %arg4[%c0_10, %c0_11, %c0_12, %c0_13] : memref<1x9x9x4xf32, #tpu.memory_space<vmem>>, vector<1x8x8x4xf32>
    %10 = vector.shape_cast %9 : vector<1x8x8x4xf32> to vector<8x8x4xf32>
    %11 = vector.shape_cast %10 : vector<8x8x4xf32> to vector<64x4xf32>
    %c0_14 = arith.constant 0 : index
    %c0_15 = arith.constant 0 : index
    %c0_16 = arith.constant 0 : index
    %c0_17 = arith.constant 0 : index
    %12 = vector.load %arg5[%c0_14, %c0_15, %c0_16, %c0_17] : memref<1x9x9x4xf32, #tpu.memory_space<vmem>>, vector<1x8x8x4xf32>
    %13 = vector.shape_cast %12 : vector<1x8x8x4xf32> to vector<8x8x4xf32>
    %14 = vector.shape_cast %13 : vector<8x8x4xf32> to vector<64x4xf32>
    %c0_18 = arith.constant 0 : index
    %c0_19 = arith.constant 0 : index
    %c1_20 = arith.constant 1 : index
    %c0_21 = arith.constant 0 : index
    %15 = vector.load %arg4[%c0_18, %c0_19, %c1_20, %c0_21] : memref<1x9x9x4xf32, #tpu.memory_space<vmem>>, vector<1x8x8x4xf32>
    %16 = vector.shape_cast %15 : vector<1x8x8x4xf32> to vector<8x8x4xf32>
    %17 = vector.shape_cast %16 : vector<8x8x4xf32> to vector<64x4xf32>
    %c0_22 = arith.constant 0 : index
    %c1_23 = arith.constant 1 : index
    %c0_24 = arith.constant 0 : index
    %c0_25 = arith.constant 0 : index
    %18 = vector.load %arg2[%c0_22, %c1_23, %c0_24, %c0_25] : memref<1x9x9x4xf32, #tpu.memory_space<vmem>>, vector<1x8x8x4xf32>
    %19 = vector.shape_cast %18 : vector<1x8x8x4xf32> to vector<8x8x4xf32>
    %20 = vector.shape_cast %19 : vector<8x8x4xf32> to vector<64x4xf32>
    %c0_26 = arith.constant 0 : index
    %c1_27 = arith.constant 1 : index
    %c0_28 = arith.constant 0 : index
    %c0_29 = arith.constant 0 : index
    %21 = vector.load %arg3[%c0_26, %c1_27, %c0_28, %c0_29] : memref<1x9x9x4xf32, #tpu.memory_space<vmem>>, vector<1x8x8x4xf32>
    %22 = vector.shape_cast %21 : vector<1x8x8x4xf32> to vector<8x8x4xf32>
    %23 = vector.shape_cast %22 : vector<8x8x4xf32> to vector<64x4xf32>
    %c0_30 = arith.constant 0 : index
    %c1_31 = arith.constant 1 : index
    %c1_32 = arith.constant 1 : index
    %c0_33 = arith.constant 0 : index
    %24 = vector.load %arg2[%c0_30, %c1_31, %c1_32, %c0_33] : memref<1x9x9x4xf32, #tpu.memory_space<vmem>>, vector<1x8x8x4xf32>
    %25 = vector.shape_cast %24 : vector<1x8x8x4xf32> to vector<8x8x4xf32>
    %26 = vector.shape_cast %25 : vector<8x8x4xf32> to vector<64x4xf32>
    %27 = tpu.concatenate %2, %5, %8, %11, %14, %17, %20, %23, %26 in 1 : vector<64x4xf32>, vector<64x4xf32>, vector<64x4xf32>, vector<64x4xf32>, vector<64x4xf32>, vector<64x4xf32>, vector<64x4xf32>, vector<64x4xf32>, vector<64x4xf32> -> vector<64x36xf32>
    %c0_34 = arith.constant 0 : index
    %c0_35 = arith.constant 0 : index
    %28 = vector.load %arg6[%c0_34, %c0_35] : memref<36x4xf32, #tpu.memory_space<vmem>>, vector<36x4xf32>
    %cst = arith.constant dense<0.000000e+00> : vector<64x4xf32>
    %29 = tpu.matmul %27, %28, %cst {dimension_numbers = #tpu.dot_dimension_numbers<[1], [0], [0], [1], [0, 0, 1, 1], [], []>} : vector<64x36xf32>, vector<36x4xf32>, vector<64x4xf32> -> vector<64x4xf32>
    %c0_36 = arith.constant 0 : index
    %c0_37 = arith.constant 0 : index
    %30 = vector.load %arg7[%c0_36, %c0_37] : memref<1x4xf32, #tpu.memory_space<vmem>>, vector<1x4xf32>
    %31 = vector.broadcast %30 : vector<1x4xf32> to vector<64x4xf32>
    %32 = arith.addf %29, %31 : vector<64x4xf32>
    %33 = vector.shape_cast %32 : vector<64x4xf32> to vector<8x8x4xf32>
    %c0_38 = arith.constant 0 : index
    %c0_39 = arith.constant 0 : index
    %c0_40 = arith.constant 0 : index
    %c0_41 = arith.constant 0 : index
    %34 = vector.load %arg8[%c0_38, %c0_39, %c0_40, %c0_41] : memref<1x8x8x4xf32, #tpu.memory_space<vmem>>, vector<1x8x8x4xf32>
    %35 = vector.shape_cast %34 : vector<1x8x8x4xf32> to vector<8x8x4xf32>
    %36 = vector.shape_cast %33 : vector<8x8x4xf32> to vector<1x8x8x4xf32>
    tpu.vector_store %arg8[%c0_38, %c0_39, %c0_40, %c0_41], %36 {strides = array<i32>} : memref<1x8x8x4xf32, #tpu.memory_space<vmem>>, vector<1x8x8x4xf32>,
    return
  }
  func.func @transform_0(%arg0: i32, %arg1: i32) -> (i32, i32, i32, i32) {
    %c0_i32 = arith.constant 0 : i32
    %c0_i32_0 = arith.constant 0 : i32
    %c0_i32_1 = arith.constant 0 : i32
    %c0_i32_2 = arith.constant 0 : i32
    return %arg1, %c0_i32, %c0_i32_0, %c0_i32_1 : i32, i32, i32, i32
  }
  func.func @transform_1(%arg0: i32, %arg1: i32) -> (i32, i32, i32, i32) {
    %c0_i32 = arith.constant 0 : i32
    %c0_i32_0 = arith.constant 0 : i32
    %c0_i32_1 = arith.constant 0 : i32
    %c0_i32_2 = arith.constant 0 : i32
    return %arg1, %c0_i32, %c0_i32_0, %c0_i32_1 : i32, i32, i32, i32
  }
  func.func @transform_2(%arg0: i32, %arg1: i32) -> (i32, i32, i32, i32) {
    %c0_i32 = arith.constant 0 : i32
    %c0_i32_0 = arith.constant 0 : i32
    %c0_i32_1 = arith.constant 0 : i32
    %c0_i32_2 = arith.constant 0 : i32
    return %arg1, %c0_i32, %c0_i32_0, %c0_i32_1 : i32, i32, i32, i32
  }
  func.func @transform_3(%arg0: i32, %arg1: i32) -> (i32, i32, i32, i32) {
    %c0_i32 = arith.constant 0 : i32
    %c0_i32_0 = arith.constant 0 : i32
    %c0_i32_1 = arith.constant 0 : i32
    %c0_i32_2 = arith.constant 0 : i32
    return %arg1, %c0_i32, %c0_i32_0, %c0_i32_1 : i32, i32, i32, i32
  }
  func.func @transform_4(%arg0: i32, %arg1: i32) -> (i32, i32) {
    %c0_i32 = arith.constant 0 : i32
    %c0_i32_0 = arith.constant 0 : i32
    return %c0_i32, %arg0 : i32, i32
  }
  func.func @transform_5(%arg0: i32, %arg1: i32) -> (i32, i32) {
    %c0_i32 = arith.constant 0 : i32
    %c0_i32_0 = arith.constant 0 : i32
    return %c0_i32, %arg0 : i32, i32
  }
  func.func @transform_6(%arg0: i32, %arg1: i32) -> (i32, i32, i32, i32) {
    %c0_i32 = arith.constant 0 : i32
    %c0_i32_0 = arith.constant 0 : i32
    %c0_i32_1 = arith.constant 0 : i32
    return %arg1, %c0_i32, %c0_i32_0, %arg0 : i32, i32, i32, i32
  }
}

</mosaic_0001>

<bundles_post_ra>
// kernel: tpu_custom_call.1
= control target key start
LH: loop header
LB: loop body
LE: loop exit
PB: predicated region body
PF: predicated region fallthrough
CT: control target
= control target key end

     0   :  { %s1158_s21 = smov 0   ;;  %s1160_s22 = smov 0   ;;  %s1502_s0 = inlined_call_operand.vmem [shape: f32[2,9,9,4], index: 0, kind: input, shape index: {}]   ;;  %s1503_s1 = inlined_call_operand.vmem [shape: f32[2,9,9,4], index: 1, kind: input, shape index: {}]   ;;  %s1504_s2 = inlined_call_operand.vmem [shape: f32[2,9,9,4], index: 2, kind: input, shape index: {}]   ;;  %s1505_s3 = inlined_call_operand.vmem [shape: f32[2,9,9,4], index: 3, kind: input, shape index: {}]   ;;  %s1506_s4 = inlined_call_operand.vmem [shape: f32[36,4], index: 4, kind: input, shape index: {}]   ;;  %s1507_s5 = inlined_call_operand.vmem [shape: f32[1,4], index: 5, kind: input, shape index: {}]   ;;  %s1508_s6 = inlined_call_operand.vmem [shape: f32[2,8,8,4], index: 6, kind: output, shape index: {}]  }
   0x1   :  { %s1162_s23 = smov 0  }
   0x2 LB: > { %s25_s24 = sadd.s32 1, %s1109_s22  ;;  %p999_p0 = scmp.ge.s32.totalorder %s1113_s23, 1  ;;  %s1113_s23 = sphi %s1162_s23, %s16_s23   ;;  %s1109_s22 = sphi %s1160_s22, %s1510_s22   ;;  %s1105_s21 = sphi %s1158_s21, %s1509_s21  }
   0x3   : > { %p26_p1 = scmp.ge.s32.totalorder %s25_s24, 2  ;;  %p273_p2 = scmp.lt.s32.totalorder %s1113_s23, 3 }
   0x5   : > { %s1512_s24 = smov (%p26_p1, %s25_s24), 0  ;;  %p274_p3 = pnand %p999_p0, %p273_p2 }
   0x6   : > { %p328_p4 = scmp.lt.s32.totalorder (!%p274_p3), %s1105_s21, 1  ;;  %s1115_s11 = smov (!%p274_p3), 4  }
   0x7   : > { %277 = sbr.rel (%p274_p3) target bundleno = 430 (0x1ae), region = 44  ;;  %s1116_s12 = smov (!%p274_p3), 8  }
   0x8   : > { %s1117_s13 = smov (!%p274_p3), 12   ;;  %s1118_s17 = smov (!%p274_p3), 16  }
   0x9   : > { %s1119_s18 = smov (!%p274_p3), 20   ;;  %s1120_s19 = smov (!%p274_p3), 24  }
   0xa   : > { %s1121_s20 = smov (!%p274_p3), 28  }
   0xc   : > { %s1514_s21 = smov (!%p328_p4, %s1105_s21), 1  ;;  %v769_v49 = vld [vmem:[%s1506_s4 + $0x20] sm:$0xf]  ;;  %vm799_vm0 = vcmask 1043456   ;;  %v768_v51 = vld [vmem:[%s1506_s4 + $0x18] sm:$0xff]  ;;  %v767_v52 = vld [vmem:[%s1506_s4 + $0x10] sm:$0xff] }
   0xd   : > { %s1057_s25 = smul.u32 144, %s1514_s21  ;;  %1043 = vmatpush.msk.msra.mxu2 %vm799_vm0, %v769_v49  ;;  %1044 = vmatpush.msk.msra.mxu3 %vm799_vm0, %v769_v49  ;;  %v766_v53 = vld [vmem:[%s1506_s4 + $0x8] sm:$0xff]  ;;  %v765_v56 = vld [vmem:[%s1506_s4] sm:$0xff]  ;;  %vm693_vm1 = vcmask 31744   ;;  %vm702_vm2 = vcmask 64512   ;;  %vm711_vm3 = vcmask 97280  }
   0xe   : > { %1030 = vmatpush.msk.msra.mxu0 %vm799_vm0, %v769_v49  ;;  %1042 = vmatpush.msk.msra.mxu1 %vm799_vm0, %v769_v49  ;;  %vm720_vm4 = vcmask 130048   ;;  %vm729_vm5 = vcmask 162816   ;;  %vm738_vm6 = vcmask 195584   ;;  %vm747_vm7 = vcmask 228352  }
   0xf   : > { %s1182_s28 = scalar_lea.vmem %s1503_s1, %s1057_s25  ;;  %s1187_s7 = scalar_lea.vmem %s1502_s0, %s1057_s25  ;;  %1046 = vmatpush.msra.mxu2 %v768_v51  ;;  %1047 = vmatpush.msra.mxu3 %v768_v51  ;;  %vm756_vm8 = vcmask 261120   ;;  %vm774_vm9 = vcmask 293888  }
  0x10   : > { %v1190_v0 = vld [vmem:[%s1182_s28 + $0x40] sm:$0xff]  ;;  %s1198_s10 = scalar_lea.vmem %s1504_s2, %s1057_s25  ;;  %s1221_s16 = scalar_lea.vmem %s1505_s3, %s1057_s25  ;;  %v1231_v10 = vld [vmem:[%s1187_s7 + $0x50] sm:$0xff]  ;;  %815 = vmatpush.msra.mxu0 %v768_v51  ;;  %1045 = vmatpush.msra.mxu1 %v768_v51 }
  0x11   : > { %v1193_v1 = vld [vmem:[%s1187_s7 + $0x41] sm:$0xff]  ;;  %453 = vrot.lane.b32.xlu0 %v1190_v0, %s1115_s11  ;;  %v1234_v11 = vld [vmem:[%s1187_s7 + $0x70] sm:$0xff]  ;;  %s1122_s25 = smov 32   ;;  %1049 = vmatpush.msra.mxu2 %v767_v52 }
  0x12   : > { %485 = vrot.lane.b32.xlu1 %v1193_v1, %s1116_s12  ;;  %v391_v2 = vld [vmem:[%s1198_s10 + $0x40] sm:$0xff]  ;;  %v1018_v14 = vld [vmem:[%s1182_s28 + $0x50] sm:$0xff]  ;;  %1050 = vmatpush.msra.mxu3 %v767_v52 }
  0x13   : > { %517 = vrot.lane.b32.xlu2 %v391_v2, %s1117_s13  ;;  %v1207_v3 = vld [vmem:[%s1182_s28 + $0x60] sm:$0xff]  ;;  %v1020_v15 = vld [vmem:[%s1182_s28 + $0x70] sm:$0xff]  ;;  %1052 = vmatpush.msra.mxu2 %v766_v53 }
  0x14   : > { %v1210_v4 = vld [vmem:[%s1187_s7 + $0x61] sm:$0xff]  ;;  %v1026_v18 = vld [vmem:[%s1187_s7 + $0x51] sm:$0xff]  ;;  %1053 = vmatpush.msra.mxu3 %v766_v53  ;;  %816 = vmatpush.msra.mxu0 %v767_v52 }
  0x15   : > { %v393_v5 = vld [vmem:[%s1198_s10 + $0x60] sm:$0xff]  ;;  %v1028_v19 = vld [vmem:[%s1187_s7 + $0x71] sm:$0xff]  ;;  %1055 = vmatpush.msra.mxu2 %v765_v56  ;;  %1048 = vmatpush.msra.mxu1 %v767_v52 }
  0x16   : > { %v399_v6 = vld [vmem:[%s1221_s16 + $0x40] sm:$0xff]  ;;  %v392_v24 = vld [vmem:[%s1198_s10 + $0x50] sm:$0xff]  ;;  %1056 = vmatpush.msra.mxu3 %v765_v56  ;;  %817 = vmatpush.msra.mxu0 %v766_v53 }
  0x17   : > { %v401_v7 = vld [vmem:[%s1221_s16 + $0x60] sm:$0xff]  ;;  %v394_v25 = vld [vmem:[%s1198_s10 + $0x70] sm:$0xff]  ;;  %1051 = vmatpush.msra.mxu1 %v766_v53 }
  0x18   : > { %v407_v8 = vld [vmem:[%s1198_s10 + $0x41] sm:$0xff]  ;;  %v400_v28 = vld [vmem:[%s1221_s16 + $0x50] sm:$0xff]  ;;  %818 = vmatpush.msra.mxu0 %v765_v56 }
  0x19   : > { %457 = vrot.lane.b32.xlu0 %v1207_v3, %s1115_s11  ;;  %v409_v9 = vld [vmem:[%s1198_s10 + $0x61] sm:$0xff]  ;;  %v402_v29 = vld [vmem:[%s1221_s16 + $0x70] sm:$0xff]  ;;  %1054 = vmatpush.msra.mxu1 %v765_v56 }
  0x1a   : > { %489 = vrot.lane.b32.xlu1 %v1210_v4, %s1116_s12  ;;  %v371_v12 = vld [vmem:[%s1182_s28] sm:$0xff]  ;;  %v1287_v30 = vld [vmem:[%s1187_s7 + $0x10] sm:$0xff] }
  0x1b   : > { %521 = vrot.lane.b32.xlu2 %v393_v5, %s1117_s13  ;;  %v1243_v13 = vld [vmem:[%s1182_s28 + $0x20] sm:$0xff]  ;;  %v1290_v31 = vld [vmem:[%s1187_s7 + $0x30] sm:$0xff] }
  0x1c   : > { %v379_v16 = vld [vmem:[%s1187_s7 + $0x1] sm:$0xff]  ;;  %v408_v33 = vld [vmem:[%s1198_s10 + $0x51] sm:$0xff] }
  0x1d   : > { %v1253_v17 = vld [vmem:[%s1187_s7 + $0x21] sm:$0xff]  ;;  %v410_v34 = vld [vmem:[%s1198_s10 + $0x71] sm:$0xff] }
  0x1e   : > { %v387_v20 = vld [vmem:[%s1198_s10] sm:$0xff]  ;;  %v1014_v35 = vld [vmem:[%s1182_s28 + $0x10] sm:$0xff] }
  0x1f   : > { %v389_v21 = vld [vmem:[%s1198_s10 + $0x20] sm:$0xff]  ;;  %v1016_v37 = vld [vmem:[%s1182_s28 + $0x30] sm:$0xff] }
  0x20   : > { %v395_v22 = vld [vmem:[%s1221_s16] sm:$0xff]  ;;  %v1022_v41 = vld [vmem:[%s1187_s7 + $0x11] sm:$0xff] }
  0x21   : > { %549 = vrot.lane.b32.xlu0 %v399_v6, %s1118_s17  ;;  %v397_v23 = vld [vmem:[%s1221_s16 + $0x20] sm:$0xff]  ;;  %v1024_v42 = vld [vmem:[%s1187_s7 + $0x31] sm:$0xff] }
  0x22   : > { %553 = vrot.lane.b32.xlu1 %v401_v7, %s1118_s17  ;;  %v403_v26 = vld [vmem:[%s1198_s10 + $0x1] sm:$0xff]  ;;  %v388_v59 = vld [vmem:[%s1198_s10 + $0x10] sm:$0xff] }
  0x23   : > { %581 = vrot.lane.b32.xlu2 %v407_v8, %s1119_s18  ;;  %v405_v27 = vld [vmem:[%s1198_s10 + $0x21] sm:$0xff]  ;;  %v390_v60 = vld [vmem:[%s1198_s10 + $0x30] sm:$0xff] }
  0x24   : > { %v1309_v38 = vld [vmem:[%s1187_s7 + $0x60] sm:$0xff]  ;;  %v396_v2 = vld [vmem:[%s1221_s16 + $0x10] sm:$0xff] }
  0x25   : > { %v1013_v39 = vld [vmem:[%s1187_s7 + $0x80] sm:$0xff] }
  0x26   : > { %v1021_v46 = vld [vmem:[%s1182_s28 + $0x80] sm:$0xff] }
  0x27   : > { %v1029_v58 = vld [vmem:[%s1187_s7 + $0x81] sm:$0xff] }
  0x28   : > { %v367_v5 = vld [vmem:[%s1187_s7 + $0x40] sm:$0xff] }
  0x29   : > { %585 = vrot.lane.b32.xlu0 %v409_v9, %s1119_s18  ;;  %v365_v8 = vld [vmem:[%s1187_s7 + $0x20] sm:$0xff] }
  0x2a   : > { %613 = vrot.lane.b32.xlu1 %v1231_v10, %s1120_s19 }
  0x2b   : > { %617 = vrot.lane.b32.xlu2 %v1234_v11, %s1120_s19 }
  0x31   : > { %445 = vrot.lane.b32.xlu0 %v371_v12, %s1115_s11 }
  0x32   : > { %449 = vrot.lane.b32.xlu1 %v1243_v13, %s1115_s11 }
  0x33   : > { %645 = vrot.lane.b32.xlu2 %v1018_v14, %s1121_s20 }
  0x39   : > { %649 = vrot.lane.b32.xlu0 %v1020_v15, %s1121_s20 }
  0x3a   : > { %477 = vrot.lane.b32.xlu1 %v379_v16, %s1116_s12  ;;  %v406_v16 = vld [vmem:[%s1198_s10 + $0x31] sm:$0xff] }
  0x3b   : > { %481 = vrot.lane.b32.xlu2 %v1253_v17, %s1116_s12 }
  0x41   : > { %677 = vrot.lane.b32.xlu0 %v1026_v18, %s1122_s25 }
  0x42   : > { %681 = vrot.lane.b32.xlu1 %v1028_v19, %s1122_s25 }
  0x43   : > { %455 = vrot.lane.b32.xlu2 %v1018_v14, %s1115_s11 }
  0x49   : > { %459 = vrot.lane.b32.xlu0 %v1020_v15, %s1115_s11 }
  0x4a   : > { %509 = vrot.lane.b32.xlu1 %v387_v20, %s1117_s13  ;;  %v363_v20 = vld [vmem:[%s1187_s7] sm:$0xff]  ;;  %s1041_s7 = sshll.u32 %s1514_s21, 6 }
  0x4b   : > { %513 = vrot.lane.b32.xlu2 %v389_v21, %s1117_s13 }
  0x51   : > { %487 = vrot.lane.b32.xlu0 %v1026_v18, %s1116_s12 }
  0x52   : > { %491 = vrot.lane.b32.xlu1 %v1028_v19, %s1116_s12 }
  0x53   : > { %541 = vrot.lane.b32.xlu2 %v395_v22, %s1118_s17 }
  0x59   : > { %545 = vrot.lane.b32.xlu0 %v397_v23, %s1118_s17 }
  0x5a   : > { %519 = vrot.lane.b32.xlu1 %v392_v24, %s1117_s13 }
  0x5b   : > { %523 = vrot.lane.b32.xlu2 %v394_v25, %s1117_s13 }
  0x61   : > { %573 = vrot.lane.b32.xlu0 %v403_v26, %s1119_s18 }
  0x62   : > { %577 = vrot.lane.b32.xlu1 %v405_v27, %s1119_s18 }
  0x63   : > { %551 = vrot.lane.b32.xlu2 %v400_v28, %s1118_s17 }
  0x69   : > { %555 = vrot.lane.b32.xlu0 %v402_v29, %s1118_s17 }
  0x6a   : > { %605 = vrot.lane.b32.xlu1 %v1287_v30, %s1120_s19 }
  0x6b   : > { %609 = vrot.lane.b32.xlu2 %v1290_v31, %s1120_s19 }
  0x6d   : > { %v1297_v32 = vpop.permute.xlu2 %517 }
  0x71   : > { %583 = vrot.lane.b32.xlu0 %v408_v33, %s1119_s18 }
  0x72   : > { %587 = vrot.lane.b32.xlu1 %v410_v34, %s1119_s18 }
  0x73   : > { %637 = vrot.lane.b32.xlu2 %v1014_v35, %s1121_s20 }
  0x75   : > { %v1305_v36 = vpop.permute.xlu2 %521 }
  0x79   : > { %641 = vrot.lane.b32.xlu0 %v1016_v37, %s1121_s20 }
  0x7a   : > { %615 = vrot.lane.b32.xlu1 %v1309_v38, %s1120_s19 }
  0x7b   : > { %619 = vrot.lane.b32.xlu2 %v1013_v39, %s1120_s19 }
  0x7d   : > { %v1316_v40 = vpop.permute.xlu2 %581 }
  0x81   : > { %669 = vrot.lane.b32.xlu0 %v1022_v41, %s1122_s25 }
  0x82   : > { %673 = vrot.lane.b32.xlu1 %v1024_v42, %s1122_s25 }
  0x83   : > { %447 = vrot.lane.b32.xlu2 %v1014_v35, %s1115_s11  ;;  %v1323_v43 = vpop.permute.xlu0 %453 }
  0x84   : > { %v1325_v44 = vpop.permute.xlu1 %485  ;;  %v698_v14 = vsel %vm693_vm1, %v367_v5, %v1323_v43 }
  0x85   : > { %v1327_v45 = vpop.permute.xlu2 %617  ;;  %v707_v19 = vsel %vm702_vm2, %v698_v14, %v1325_v44 }
  0x86   : > { %v716_v22 = vsel %vm711_vm3, %v707_v19, %v1297_v32 }
  0x89   : > { %451 = vrot.lane.b32.xlu0 %v1016_v37, %s1115_s11 }
  0x8a   : > { %647 = vrot.lane.b32.xlu1 %v1207_v3, %s1121_s20  ;;  %v398_v3 = vld [vmem:[%s1221_s16 + $0x30] sm:$0xff] }
  0x8b   : > { %651 = vrot.lane.b32.xlu2 %v1021_v46, %s1121_s20  ;;  %v458_v47 = vpop.permute.xlu0 %457 }
  0x8c   : > { %v1334_v48 = vpop.permute.xlu1 %489  ;;  %v700_v18 = vsel %vm693_vm1, %v1309_v38, %v458_v47 }
  0x8d   : > { %v1339_v50 = vpop.permute.xlu2 %645  ;;  %v709_v21 = vsel %vm702_vm2, %v700_v18, %v1334_v48 }
  0x8e   : > { %v718_v29 = vsel %vm711_vm3, %v709_v21, %v1305_v36 }
  0x91   : > { %479 = vrot.lane.b32.xlu0 %v1022_v41, %s1116_s12 }
  0x92   : > { %483 = vrot.lane.b32.xlu1 %v1024_v42, %s1116_s12 }
  0x93   : > { %679 = vrot.lane.b32.xlu2 %v1210_v4, %s1122_s25  ;;  %v550_v54 = vpop.permute.xlu0 %549  ;;  %v404_v4 = vld [vmem:[%s1198_s10 + $0x11] sm:$0xff] }
  0x94   : > { %v554_v55 = vpop.permute.xlu1 %553  ;;  %v725_v26 = vsel %vm720_vm4, %v716_v22, %v550_v54 }
  0x95   : > { %v482_v57 = vpop.permute.xlu2 %481  ;;  %v727_v33 = vsel %vm720_vm4, %v718_v29, %v554_v55  ;;  %v734_v32 = vsel %vm729_vm5, %v725_v26, %v1316_v40 }
  0x99   : > { %683 = vrot.lane.b32.xlu0 %v1029_v58, %s1122_s25 }
  0x9a   : > { %511 = vrot.lane.b32.xlu1 %v388_v59, %s1117_s13 }
  0x9b   : > { %515 = vrot.lane.b32.xlu2 %v390_v60, %s1117_s13  ;;  %v586_v61 = vpop.permute.xlu0 %585 }
  0x9c   : > { %v614_v62 = vpop.permute.xlu1 %613  ;;  %v736_v34 = vsel %vm729_vm5, %v727_v33, %v586_v61 }
  0x9d   : > { %v1363_v63 = vpop.permute.xlu2 %455  ;;  %v743_v35 = vsel %vm738_vm6, %v734_v32, %v614_v62  ;;  %v745_v36 = vsel %vm738_vm6, %v736_v34, %v1327_v45 }
  0x9e   : > { %v752_v40 = vsel %vm747_vm7, %v743_v35, %v1339_v50 }
  0xa1   : > { %543 = vrot.lane.b32.xlu0 %v396_v2, %s1118_s17 }
  0xa2   : > { %547 = vrot.lane.b32.xlu1 %v398_v3, %s1118_s17  ;;  %s362_s17 = scalar_lea.vmem %s1508_s6, %s1041_s7 }
  0xa3   : > { %575 = vrot.lane.b32.xlu2 %v404_v4, %s1119_s18  ;;  %v446_v6 = vpop.permute.xlu0 %445 }
  0xa4   : > { %v450_v7 = vpop.permute.xlu1 %449  ;;  %v694_v23 = vsel %vm693_vm1, %v363_v20, %v446_v6 }
  0xa5   : > { %v696_v9 = vsel %vm693_vm1, %v365_v8, %v450_v7  ;;  %v1374_v12 = vpop.permute.xlu2 %513 }
  0xa6   : > { %v1379_v15 = vsel %vm702_vm2, %v696_v9, %v482_v57 }
  0xa7   : > { %v714_v62 = vsel %vm711_vm3, %v1379_v15, %v1374_v12  ;;  %v699_v12 = vsel %vm693_vm1, %v1231_v10, %v1363_v63 }
  0xa9   : > { %579 = vrot.lane.b32.xlu0 %v406_v16, %s1119_s18 }
  0xaa   : > { %607 = vrot.lane.b32.xlu1 %v365_v8, %s1120_s19 }
  0xab   : > { %611 = vrot.lane.b32.xlu2 %v367_v5, %s1120_s19  ;;  %v650_v24 = vpop.permute.xlu0 %649 }
  0xac   : > { %v478_v25 = vpop.permute.xlu1 %477  ;;  %v754_v37 = vsel %vm747_vm7, %v745_v36, %v650_v24 }
  0xad   : > { %v703_v27 = vsel %vm702_vm2, %v694_v23, %v478_v25  ;;  %v542_v28 = vpop.permute.xlu2 %541 }
  0xb1   : > { %639 = vrot.lane.b32.xlu0 %v1243_v13, %s1121_s20 }
  0xb2   : > { %643 = vrot.lane.b32.xlu1 %v1190_v0, %s1121_s20 }
  0xb3   : > { %671 = vrot.lane.b32.xlu2 %v1253_v17, %s1122_s25  ;;  %v678_v38 = vpop.permute.xlu0 %677 }
  0xb4   : > { %v682_v39 = vpop.permute.xlu1 %681  ;;  %v761_v13 = vsel %vm756_vm8, %v752_v40, %v678_v38 }
  0xb5   : > { %v763_v41 = vsel %vm756_vm8, %v754_v37, %v682_v39  ;;  %1035 = vmatmul.msk.f32.vlgmr.msra.gmra.mxu2 %vm774_vm9, %v761_v13  ;;  %v524_v0 = vpop.permute.xlu2 %523 }
  0xb6   : > { %1037 = vmatmul.msk.f32.vlgmr.msra.gmra.mxu3 %vm774_vm9, %v763_v41 }
  0xb9   : > { %675 = vrot.lane.b32.xlu0 %v1193_v1, %s1122_s25 }
  0xbb   : > { %v460_v17 = vpop.permute.xlu0 %459 }
  0xbc   : > { %v510_v42 = vpop.permute.xlu1 %509  ;;  %v701_v44 = vsel %vm693_vm1, %v1234_v11, %v460_v17 }
  0xbd   : > { %v552_v43 = vpop.permute.xlu2 %551  ;;  %v712_v11 = vsel %vm711_vm3, %v703_v27, %v510_v42 }
  0xbe   : > { %v721_v3 = vsel %vm720_vm4, %v712_v11, %v542_v28  ;;  %v1090_v11 = vld [vmem:[%s1507_s5] ss:$0 sm:$0xff] }
  0xc3   : > { %v488_v45 = vpop.permute.xlu0 %487 }
  0xc4   : > { %v492_v46 = vpop.permute.xlu1 %491  ;;  %v708_v20 = vsel %vm702_vm2, %v699_v12, %v488_v45 }
  0xc5   : > { %v710_v47 = vsel %vm702_vm2, %v701_v44, %v492_v46  ;;  %v610_v49 = vpop.permute.xlu2 %609 }
  0xc6   : > { %v719_v48 = vsel %vm711_vm3, %v710_v47, %v524_v0 }
  0xcb   : > { %v546_v50 = vpop.permute.xlu0 %545 }
  0xcc   : > { %v520_v51 = vpop.permute.xlu1 %519  ;;  %v723_v2 = vsel %vm720_vm4, %v714_v62, %v546_v50 }
  0xcd   : > { %v638_v54 = vpop.permute.xlu2 %637  ;;  %v717_v21 = vsel %vm711_vm3, %v708_v20, %v520_v51 }
  0xce   : > { %v726_v22 = vsel %vm720_vm4, %v717_v21, %v552_v43 }
  0xd3   : > { %v574_v52 = vpop.permute.xlu0 %573 }
  0xd4   : > { %v578_v53 = vpop.permute.xlu1 %577  ;;  %v730_v4 = vsel %vm729_vm5, %v721_v3, %v574_v52 }
  0xd5   : > { %v620_v56 = vpop.permute.xlu2 %619  ;;  %v732_v5 = vsel %vm729_vm5, %v723_v2, %v578_v53 }
  0xd6   : > { %v741_v8 = vsel %vm738_vm6, %v732_v5, %v610_v49 }
  0xdb   : > { %v556_v55 = vpop.permute.xlu0 %555 }
  0xdc   : > { %v606_v1 = vpop.permute.xlu1 %605  ;;  %v728_v33 = vsel %vm720_vm4, %v719_v48, %v556_v55 }
  0xdd   : > { %v448_v59 = vpop.permute.xlu2 %447  ;;  %v739_v6 = vsel %vm738_vm6, %v730_v4, %v606_v1 }
  0xde   : > { %v748_v18 = vsel %vm747_vm7, %v739_v6, %v638_v54  ;;  %v695_v42 = vsel %vm693_vm1, %v1287_v30, %v448_v59 }
  0xe3   : > { %v584_v57 = vpop.permute.xlu0 %583 }
  0xe4   : > { %v588_v58 = vpop.permute.xlu1 %587  ;;  %v735_v23 = vsel %vm729_vm5, %v726_v22, %v584_v57 }
  0xe5   : > { %v652_v7 = vpop.permute.xlu2 %651  ;;  %v737_v34 = vsel %vm729_vm5, %v728_v33, %v588_v58 }
  0xe6   : > { %v746_v35 = vsel %vm738_vm6, %v737_v34, %v620_v56 }
  0xe7   : > { %v755_v36 = vsel %vm747_vm7, %v746_v35, %v652_v7 }
  0xeb   : > { %v642_v60 = vpop.permute.xlu0 %641 }
  0xec   : > { %v616_v61 = vpop.permute.xlu1 %615  ;;  %v750_v9 = vsel %vm747_vm7, %v741_v8, %v642_v60 }
  0xed   : > { %v680_v24 = vpop.permute.xlu2 %679  ;;  %v744_v25 = vsel %vm738_vm6, %v735_v23, %v616_v61 }
  0xf3   : > { %v670_v14 = vpop.permute.xlu0 %669 }
  0xf4   : > { %v674_v16 = vpop.permute.xlu1 %673  ;;  %v757_v15 = vsel %vm756_vm8, %v748_v18, %v670_v14 }
  0xf5   : > { %v759_v19 = vsel %vm756_vm8, %v750_v9, %v674_v16  ;;  %1031 = vmatmul.msk.f32.vlgmr.msra.gmra.mxu0 %vm774_vm9, %v757_v15  ;;  %v516_v32 = vpop.permute.xlu2 %515 }
  0xf6   : > { %1033 = vmatmul.msk.f32.vlgmr.msra.gmra.mxu1 %vm774_vm9, %v759_v19 }
  0xfb   : > { %v452_v10 = vpop.permute.xlu0 %451 }
  0xfc   : > { %v648_v63 = vpop.permute.xlu1 %647  ;;  %v697_v47 = vsel %vm693_vm1, %v1290_v31, %v452_v10 }
  0xfd   : > { %v753_v26 = vsel %vm747_vm7, %v744_v25, %v648_v63  ;;  %v576_v40 = vpop.permute.xlu2 %575 }
  0xfe   : > { %v762_v27 = vsel %vm756_vm8, %v753_v26, %v680_v24 }
  0xff   : > { %1036 = vmatmul.msk.f32.gmra.mxu2 %vm774_vm9, %v762_v27 }
 0x103   : > { %v480_v28 = vpop.permute.xlu0 %479 }
 0x104   : > { %v484_v29 = vpop.permute.xlu1 %483  ;;  %v704_v43 = vsel %vm702_vm2, %v695_v42, %v480_v28 }
 0x105   : > { %v612_v0 = vpop.permute.xlu2 %611  ;;  %v706_v48 = vsel %vm702_vm2, %v697_v47, %v484_v29 }
 0x106   : > { %v715_v53 = vsel %vm711_vm3, %v706_v48, %v516_v32 }
 0x10b   : > { %v684_v37 = vpop.permute.xlu0 %683 }
 0x10c   : > { %v512_v38 = vpop.permute.xlu1 %511  ;;  %v764_v39 = vsel %vm756_vm8, %v755_v36, %v684_v37 }
 0x10d   : > { %1038 = vmatmul.msk.f32.gmra.mxu3 %vm774_vm9, %v764_v39  ;;  %v713_v44 = vsel %vm711_vm3, %v704_v43, %v512_v38  ;;  %v672_v50 = vpop.permute.xlu2 %671 }
 0x113   : > { %v544_v13 = vpop.permute.xlu0 %543 }
 0x114   : > { %v548_v41 = vpop.permute.xlu1 %547  ;;  %v722_v46 = vsel %vm720_vm4, %v713_v44, %v544_v13 }
 0x115   : > { %v731_v49 = vsel %vm729_vm5, %v722_v46, %v576_v40  ;;  %v724_v55 = vsel %vm720_vm4, %v715_v53, %v548_v41 }
 0x11b   : > { %v580_v17 = vpop.permute.xlu0 %579 }
 0x11c   : > { %v608_v45 = vpop.permute.xlu1 %607  ;;  %v733_v31 = vsel %vm729_vm5, %v724_v55, %v580_v17 }
 0x11d   : > { %v740_v51 = vsel %vm738_vm6, %v731_v49, %v608_v45  ;;  %v742_v56 = vsel %vm738_vm6, %v733_v31, %v612_v0 }
 0x123   : > { %v640_v52 = vpop.permute.xlu0 %639 }
 0x124   : > { %v749_v30 = vsel %vm747_vm7, %v740_v51, %v640_v52  ;;  %v644_v1 = vpop.permute.xlu1 %643 }
 0x125   : > { %v758_v54 = vsel %vm756_vm8, %v749_v30, %v672_v50  ;;  %v751_v57 = vsel %vm747_vm7, %v742_v56, %v644_v1 }
 0x126   : > { %1032 = vmatmul.msk.f32.gmra.mxu0 %vm774_vm9, %v758_v54 }
 0x12b   : > { %v676_v58 = vpop.permute.xlu0 %675 }
 0x12c   : > { %v760_v59 = vsel %vm756_vm8, %v751_v57, %v676_v58 }
 0x12d   : > { %1034 = vmatmul.msk.f32.gmra.mxu1 %vm774_vm9, %v760_v59 }
 0x138   : > { %v832_v60 = vpop.f32.mrf.mxu2 }
 0x139   : > { %v838_v61 = vpop.f32.mrf.mxu3  ;;  %v833_v62 = vadd.f32 %v1090_v11, %v832_v60 }
 0x13a   : > { %v839_v2 = vadd.f32 %v1090_v11, %v838_v61 }
 0x13b   : > { %848 = vst.msk [vmem:[%s362_s17 + $0x20] sm:$0xff] %vm693_vm1, %v833_v62 }
 0x13c   : > { %850 = vst.msk [vmem:[%s362_s17 + $0x30] sm:$0xff] %vm693_vm1, %v839_v2 }
 0x172   : > { %v820_v3 = vpop.f32.mrf.mxu0 }
 0x173   : > { %v826_v4 = vpop.f32.mrf.mxu1  ;;  %v821_v5 = vadd.f32 %v1090_v11, %v820_v3 }
 0x174   : > { %v827_v6 = vadd.f32 %v1090_v11, %v826_v4 }
 0x175   : > { %844 = vst.msk [vmem:[%s362_s17] sm:$0xff] %vm693_vm1, %v821_v5 }
 0x176   : > { %846 = vst.msk [vmem:[%s362_s17 + $0x10] sm:$0xff] %vm693_vm1, %v827_v6 }
 0x182   : > { %v835_v7 = vpop.f32.mrf.mxu2 }
 0x183   : > { %v836_v8 = vadd.f32 %v1090_v11, %v835_v7 }
 0x185   : > { %849 = vst.msk [vmem:[%s362_s17 + $0x28] sm:$0xff] %vm693_vm1, %v836_v8 }
 0x190   : > { %v841_v9 = vpop.f32.mrf.mxu3 }
 0x191   : > { %v842_v14 = vadd.f32 %v1090_v11, %v841_v9 }
 0x193   : > { %851 = vst.msk [vmem:[%s362_s17 + $0x38] sm:$0xff] %vm693_vm1, %v842_v14 }
 0x1a3   : > { %v823_v16 = vpop.f32.mrf.mxu0 }
 0x1a4   : > { %v824_v18 = vadd.f32 %v1090_v11, %v823_v16 }
 0x1a6   : > { %845 = vst.msk [vmem:[%s362_s17 + $0x8] sm:$0xff] %vm693_vm1, %v824_v18 }
 0x1aa   : > { %v829_v12 = vpop.f32.mrf.mxu1 }
 0x1ab   : > { %v830_v15 = vadd.f32 %v1090_v11, %v829_v12 }
 0x1ad   : > { %847 = vst.msk [vmem:[%s362_s17 + $0x18] sm:$0xff] %vm693_vm1, %v830_v15 }
 0x1ae PF: > { %s16_s23 = sadd.s32 1, %s1113_s23   ;;  %s1509_s21 = smov %s1109_s22 }
 0x1af   : > { %p13_p5 = scmp.ge.s32.totalorder %s16_s23, 4   ;;  %s1510_s22 = smov %s1512_s24 }
 0x1b1   :  { %15 = sbr.rel (!%p13_p5) target bundleno = 2 (0x2), region = 91 }

</bundles_post_ra>
